<compile_context>
chip_gen: v7x
topology: tpu7x:2x2x1
jax: 0.10.0
libtpu: 0.0.40
codegen_flags: <defaults>
</compile_context>

<pallas_src>
import functools

import numpy as np

import jax
import jax.numpy as jnp
from jax.experimental import pallas as pl
from jax.experimental.pallas import tpu as pltpu


def _round_up(x, m):
    return ((x + m - 1) // m) * m


def _round_down(x, m):
    return (x // m) * m


def _choose_row_tile(rows_pad, tile_m):
    """Row tile: multiple of 128, and >= 2 tiles where possible (v7x megacore)."""
    tm = min(tile_m, rows_pad)
    if rows_pad >= 256:
        tm = min(tm, max(_round_down(rows_pad // 2, 128), 128))
    return max(_round_down(tm, 128), 128)


def _sage_layer_kernel(a_ref, x_all_ref, x_self_ref, w_self_ref, w_neigh_ref,
                       b_ref, o_ref, self_acc, neigh_acc, *, apply_relu):
    """One GraphSAGE-mean layer for a row tile of nodes.

    Grid = (row tile i [parallel], reduction tile k [arbitrary]).
      self_acc  = X_self[i] @ W_self + b          (computed once, at k == 0)
      neigh_acc = sum_k A[i, k] @ X[k]            (f32 VMEM accumulator)
      out       = act( self_acc + neigh_acc @ W_neigh )      (last k only)
    which equals act( cat([X_self, mean_neigh]) @ W + b ) with W split row-wise.
    """
    k = pl.program_id(1)

    @pl.when(k == 0)
    def _():
        neigh_acc[...] = jnp.zeros_like(neigh_acc)
        self_acc[...] = (jnp.dot(x_self_ref[...], w_self_ref[...],
                                 preferred_element_type=jnp.float32)
                         + b_ref[...])

    # Mean aggregation of neighbour features (rows of A_norm carry 1/deg(i)).
    neigh_acc[...] += jnp.dot(a_ref[...], x_all_ref[...],
                              preferred_element_type=jnp.float32)

    @pl.when(k == pl.num_programs(1) - 1)
    def _():
        neigh = neigh_acc[...].astype(w_neigh_ref.dtype)
        out = self_acc[...] + jnp.dot(neigh, w_neigh_ref[...],
                                      preferred_element_type=jnp.float32)
        if apply_relu:
            out = jnp.maximum(out, 0.0)
        o_ref[...] = out.astype(o_ref.dtype)


def _vmem_bytes_estimate(tm, tk, f_pad, h_pad, out_bytes):
    """Rough double-buffered working-set size for one layer's pallas_call."""
    bf16 = 2
    return (2 * tm * tk * bf16            # A tile (double-buffered)
            + 2 * tk * f_pad * bf16       # X reduction slab
            + 2 * tm * f_pad * bf16       # X self rows
            + 2 * 2 * f_pad * h_pad * bf16  # W_self, W_neigh
            + 2 * 8 * h_pad * 4           # bias tile
            + 2 * tm * h_pad * out_bytes  # output tile
            + tm * f_pad * 4              # neighbour accumulator (f32)
            + tm * h_pad * 4)             # self-path accumulator (f32)


def sage_layer_padded(a_rows, x_all, x_self, w_self, w_neigh, b2d, *,
                      apply_relu, tile_m, tile_k, out_dtype):
    """act( cat([x_self, a_rows @ x_all], -1) @ [W_self; W_neigh] + b ) on padded arrays.

    a_rows : (Rp, Np) bf16 row-normalized adjacency rows (zero-padded)
    x_all  : (Np, Fp) bf16 node features for aggregation (zero-padded)
    x_self : (Rp, Fp) bf16 self features of the output rows
    w_self : (Fp, Hp) bf16   (rows 0..F-1   of torch Linear .weight.T)
    w_neigh: (Fp, Hp) bf16   (rows F..2F-1  of torch Linear .weight.T)
    b2d    : (1, Hp)  f32
    Rp must be a multiple of tile_m, Np of tile_k; Fp, Hp multiples of 128.
    """
    rows_pad, red_pad = a_rows.shape
    red_pad2, f_pad = x_all.shape
    h_pad = w_self.shape[1]
    assert red_pad2 == red_pad
    assert x_self.shape == (rows_pad, f_pad)
    assert w_self.shape == (f_pad, h_pad) and w_neigh.shape == (f_pad, h_pad)
    assert b2d.shape == (1, h_pad)
    assert rows_pad % tile_m == 0 and red_pad % tile_k == 0
    assert f_pad % 128 == 0 and h_pad % 128 == 0

    out_bytes = jnp.dtype(out_dtype).itemsize
    vmem_est = _vmem_bytes_estimate(tile_m, tile_k, f_pad, h_pad, out_bytes)
    assert vmem_est <= 40 * 2**20, (
        f"tile config needs ~{vmem_est >> 20} MiB VMEM; shrink tile_m/tile_k "
        "(v7x has only 64 MiB physical VMEM per TensorCore)")
    # Generation-safe: always above v5e's 16 MiB scoped default when needed,
    # always well under v7x's 64 MiB physical VMEM.
    vmem_limit = int(min(max(vmem_est * 13 // 10, 24 * 2**20), 48 * 2**20))

    grid = (rows_pad // tile_m, red_pad // tile_k)
    kernel = functools.partial(_sage_layer_kernel, apply_relu=apply_relu)

    # TODO(synk): W_self / W_neigh / bias are grid-invariant (and X_self is constant
    # along k); single-buffering them via pipeline_mode=pl.Buffered(1) would free a
    # little VMEM headroom once confirmed across target jax versions (minor at
    # 128-wide hidden sizes).
    return pl.pallas_call(
        kernel,
        out_shape=jax.ShapeDtypeStruct((rows_pad, h_pad), out_dtype),
        grid_spec=pltpu.PrefetchScalarGridSpec(
            num_scalar_prefetch=0,
            grid=grid,
            in_specs=[
                pl.BlockSpec((tile_m, tile_k), lambda i, k: (i, k)),  # A tile
                pl.BlockSpec((tile_k, f_pad), lambda i, k: (k, 0)),   # X reduction slab
                pl.BlockSpec((tile_m, f_pad), lambda i, k: (i, 0)),   # X self rows
                pl.BlockSpec((f_pad, h_pad), lambda i, k: (0, 0)),    # W_self
                pl.BlockSpec((f_pad, h_pad), lambda i, k: (0, 0)),    # W_neigh
                pl.BlockSpec((1, h_pad), lambda i, k: (0, 0)),        # bias
            ],
            out_specs=pl.BlockSpec((tile_m, h_pad), lambda i, k: (i, 0)),
            scratch_shapes=[pltpu.VMEM((tile_m, h_pad), jnp.float32),
                            pltpu.VMEM((tile_m, f_pad), jnp.float32)],
        ),
        compiler_params=pltpu.CompilerParams(
            dimension_semantics=("parallel", "arbitrary"),
            vmem_limit_bytes=vmem_limit),
    )(a_rows, x_all, x_self, w_self, w_neigh, b2d)


def prepare_gcn6(a_norm, params, *, tile_m=1024, tile_k=2048):
    """One-time setup: pad/cast A and all six layers' weights (hoisted out of forward)."""
    n = int(a_norm.shape[0])
    n_pad0 = _round_up(n, 128)
    tm = _choose_row_tile(n_pad0, tile_m)
    tk = max(_round_down(min(tile_k, n_pad0), 128), 128)
    n_pad = n_pad0
    while n_pad % tm != 0 or n_pad % tk != 0:
        n_pad += 128

    a_pad = jnp.zeros((n_pad, n_pad), jnp.bfloat16)
    a_pad = a_pad.at[:n, :n].set(
        jnp.asarray(a_norm, jnp.float32).astype(jnp.bfloat16))

    layers = []
    for layer in range(1, 7):
        w = jnp.asarray(params[f"w{layer}"], jnp.float32)
        b = jnp.asarray(params[f"b{layer}"], jnp.float32)
        f_in = w.shape[0] // 2
        h_out = w.shape[1]
        f_pad = _round_up(f_in, 128)
        h_pad = _round_up(h_out, 128)
        w_self = jnp.zeros((f_pad, h_pad), jnp.bfloat16)
        w_self = w_self.at[:f_in, :h_out].set(w[:f_in].astype(jnp.bfloat16))
        w_neigh = jnp.zeros((f_pad, h_pad), jnp.bfloat16)
        w_neigh = w_neigh.at[:f_in, :h_out].set(w[f_in:].astype(jnp.bfloat16))
        b2d = jnp.zeros((1, h_pad), jnp.float32).at[0, :h_out].set(b)
        layers.append(dict(w_self=w_self, w_neigh=w_neigh, b2d=b2d,
                           f_in=f_in, f_pad=f_pad, h_out=h_out, h_pad=h_pad))

    return dict(a_pad=a_pad, layers=layers, n=n, n_pad=n_pad, tm=tm, tk=tk)


def gcn6_forward(prep, feats, batch):
    """GCN6.forward: pre-softmax label scores for `batch` nodes (eval mode)."""
    n, n_pad, tm, tk = prep["n"], prep["n_pad"], prep["tm"], prep["tk"]
    layers = prep["layers"]
    a_pad = prep["a_pad"]

    f_in0, f_pad0 = layers[0]["f_in"], layers[0]["f_pad"]
    assert feats.shape == (n, f_in0), (feats.shape, (n, f_in0))
    x = jnp.zeros((n_pad, f_pad0), jnp.bfloat16)
    x = x.at[:n, :f_in0].set(jnp.asarray(feats, jnp.float32).astype(jnp.bfloat16))

    # gc1 .. gc5 over all nodes (the next layer's aggregation needs every node's
    # embedding).  ReLU; dropout is an eval-mode no-op.
    for lyr in layers[:5]:
        x = sage_layer_padded(a_pad, x, x, lyr["w_self"], lyr["w_neigh"],
                              lyr["b2d"], apply_relu=True,
                              tile_m=tm, tile_k=tk, out_dtype=jnp.bfloat16)

    # gc6: restricted to the `batch` rows — gather their adjacency rows and self
    # features instead of streaming the full (Np, Np) adjacency a sixth time.
    batch_arr = jnp.asarray(batch, jnp.int32)
    n_batch = int(batch_arr.shape[0])
    lyr = layers[5]
    tm6 = _choose_row_tile(_round_up(n_batch, 128), tm)
    b_pad = _round_up(_round_up(n_batch, 128), tm6)

    a_b = jnp.zeros((b_pad, n_pad), jnp.bfloat16).at[:n_batch].set(a_pad[batch_arr])
    x_b = jnp.zeros((b_pad, lyr["f_pad"]), jnp.bfloat16).at[:n_batch].set(x[batch_arr])

    logits = sage_layer_padded(a_b, x, x_b, lyr["w_self"], lyr["w_neigh"],
                               lyr["b2d"], apply_relu=False,
                               tile_m=tm6, tile_k=tk, out_dtype=jnp.float32)
    return logits[:n_batch, :lyr["h_out"]]


def _linear_init(key, fan_in, fan_out):
    """Deterministic PyTorch-nn.Linear-style uniform init, stored as (in, out)."""
    kw, kb = jax.random.split(key)
    bound = 1.0 / jnp.sqrt(jnp.float32(fan_in))
    w = jax.random.uniform(kw, (fan_in, fan_out), jnp.float32, -bound, bound)
    b = jax.random.uniform(kb, (fan_out,), jnp.float32, -bound, bound)
    return w, b


def build_normalized_adjacency(adj_list, num_nodes):
    """Dense row-normalized adjacency: A[i, j] = 1/deg(i) for j in N(i)."""
    a = np.zeros((num_nodes, num_nodes), np.float32)
    for node, neighbors in adj_list.items():
        nbrs = list(neighbors)
        if not nbrs:
            continue
        a[node, nbrs] = 1.0 / len(nbrs)
    return jnp.asarray(a)


if __name__ == "__main__":
    # Multi-tile but still small problem: 200-node graph (pads to 256, so the 128
    # tiles below give a (2, 2) grid per layer and exercise the k-accumulator reset,
    # multi-row-tile writeback and pipelining paths), 96-d features, 64 hidden units,
    # 10 labels, 6 GraphSAGE layers, batch of 50 nodes for the final layer.
    num_nodes, num_feats, num_hidden, num_labels = 200, 96, 64, 10

    key = jax.random.PRNGKey(0)
    keys = jax.random.split(key, 8)

    feats = jax.random.normal(keys[0], (num_nodes, num_feats), jnp.float32)

    # Ring graph plus a few chords (deterministic adjacency list).
    adj_list = {i: {(i - 1) % num_nodes, (i + 1) % num_nodes,
                    (i + 7) % num_nodes, (i + 31) % num_nodes}
                for i in range(num_nodes)}
    a_norm = build_normalized_adjacency(adj_list, num_nodes)

    # gc1: Linear(2F, H); gc2..gc5: Linear(2H, H); gc6: Linear(2H, L).
    layer_dims = ([(2 * num_feats, num_hidden)]
                  + [(2 * num_hidden, num_hidden)] * 4
                  + [(2 * num_hidden, num_labels)])
    params = {}
    for idx, (fi, fo) in enumerate(layer_dims, start=1):
        w, b = _linear_init(keys[idx], fi, fo)
        params[f"w{idx}"] = w
        params[f"b{idx}"] = b

    batch = list(range(0, 100, 2))   # 50 nodes

    # Small tiles here (vs the tm=1024 / tk=2048 production defaults) so the padded
    # 256-node graph still produces a multi-tile grid on both axes.
    prep = prepare_gcn6(a_norm, params, tile_m=128, tile_k=128)
    out = gcn6_forward(prep, feats, batch)
    out = jax.block_until_ready(out)
    assert out.shape == (len(batch), num_labels), out.shape

    # Pure-JAX reference mirroring the kernel's numerical path
    # (bf16 matmul operands, f32 accumulation, bf16 inter-layer activations).
    a_bf16 = a_norm.astype(jnp.bfloat16)

    def ref_layer(x, w, b, relu):
        f_in = w.shape[0] // 2
        xb = x.astype(jnp.bfloat16)
        neigh = jnp.dot(a_bf16, xb,
                        preferred_element_type=jnp.float32).astype(jnp.bfloat16)
        z = (jnp.dot(xb, w[:f_in].astype(jnp.bfloat16),
                     preferred_element_type=jnp.float32)
             + jnp.dot(neigh, w[f_in:].astype(jnp.bfloat16),
                       preferred_element_type=jnp.float32)
             + b)
        return jnp.maximum(z, 0.0) if relu else z

    xr = feats
    for idx in range(1, 7):
        xr = ref_layer(xr, params[f"w{idx}"], params[f"b{idx}"], relu=idx < 6)
    ref = xr[jnp.asarray(batch)]

    assert jnp.allclose(out, ref, atol=2e-2, rtol=2e-2), (
        float(jnp.max(jnp.abs(out - ref))))

    print("KERNEL_OK")
</pallas_src>

<mosaic_0001>
module attributes {stable_mosaic.version = 11 : i64} {
  func.func @_sage_layer_kernel(%arg0: i32, %arg1: i32, %arg2: memref<128x128xbf16, #tpu.memory_space<vmem>>, %arg3: memref<128x128xbf16, #tpu.memory_space<vmem>>, %arg4: memref<128x128xbf16, #tpu.memory_space<vmem>>, %arg5: memref<128x128xbf16, #tpu.memory_space<vmem>>, %arg6: memref<128x128xbf16, #tpu.memory_space<vmem>>, %arg7: memref<1x128xf32, #tpu.memory_space<vmem>>, %arg8: memref<128x128xbf16, #tpu.memory_space<vmem>>, %arg9: memref<128x128xf32, #tpu.memory_space<vmem>>, %arg10: memref<128x128xf32, #tpu.memory_space<vmem>>) attributes {dimension_semantics = [#tpu.dimension_semantics<parallel>, #tpu.dimension_semantics<arbitrary>], iteration_bounds = array<i64: 2, 2>, scalar_prefetch = 0 : i64, scratch_operands = 2 : i64, tpu.core_type = #tpu.core_type<tc>, window_params = [{transform_indices = @transform_0, window_bounds = array<i64: 128, 128>}, {transform_indices = @transform_1, window_bounds = array<i64: 128, 128>}, {transform_indices = @transform_2, window_bounds = array<i64: 128, 128>}, {pipeline_mode = #tpu.pipeline_mode<synchronous>, transform_indices = @transform_3, window_bounds = array<i64: 128, 128>}, {pipeline_mode = #tpu.pipeline_mode<synchronous>, transform_indices = @transform_4, window_bounds = array<i64: 128, 128>}, {pipeline_mode = #tpu.pipeline_mode<synchronous>, transform_indices = @transform_5, window_bounds = array<i64: 1, 128>}, {transform_indices = @transform_6, window_bounds = array<i64: 128, 128>}]} {
    %c0_i32 = arith.constant 0 : i32
    %0 = arith.cmpi eq, %arg1, %c0_i32 : i32
    %1 = arith.extui %0 : i1 to i32
    %c0_i32_0 = arith.constant 0 : i32
    %2 = arith.cmpi ne, %1, %c0_i32_0 : i32
    scf.if %2 {
      %cst_9 = arith.constant 0.000000e+00 : f32
      %12 = vector.broadcast %cst_9 : f32 to vector<128x128xf32>
      %c0_10 = arith.constant 0 : index
      %c0_11 = arith.constant 0 : index
      %13 = vector.load %arg10[%c0_10, %c0_11] : memref<128x128xf32, #tpu.memory_space<vmem>>, vector<128x128xf32>
      tpu.vector_store %arg10[%c0_10, %c0_11], %12 {strides = array<i32>} : memref<128x128xf32, #tpu.memory_space<vmem>>, vector<128x128xf32>,
      %c0_12 = arith.constant 0 : index
      %c0_13 = arith.constant 0 : index
      %14 = vector.load %arg4[%c0_12, %c0_13] : memref<128x128xbf16, #tpu.memory_space<vmem>>, vector<128x128xbf16>
      %c0_14 = arith.constant 0 : index
      %c0_15 = arith.constant 0 : index
      %15 = vector.load %arg5[%c0_14, %c0_15] : memref<128x128xbf16, #tpu.memory_space<vmem>>, vector<128x128xbf16>
      %cst_16 = arith.constant dense<0.000000e+00> : vector<128x128xf32>
      %16 = tpu.matmul %14, %15, %cst_16 {dimension_numbers = #tpu.dot_dimension_numbers<[1], [0], [0], [1], [0, 0, 1, 1], [], []>} : vector<128x128xbf16>, vector<128x128xbf16>, vector<128x128xf32> -> vector<128x128xf32>
      %c0_17 = arith.constant 0 : index
      %c0_18 = arith.constant 0 : index
      %17 = vector.load %arg7[%c0_17, %c0_18] : memref<1x128xf32, #tpu.memory_space<vmem>>, vector<1x128xf32>
      %18 = vector.broadcast %17 : vector<1x128xf32> to vector<128x128xf32>
      %19 = arith.addf %16, %18 : vector<128x128xf32>
      %c0_19 = arith.constant 0 : index
      %c0_20 = arith.constant 0 : index
      %20 = vector.load %arg9[%c0_19, %c0_20] : memref<128x128xf32, #tpu.memory_space<vmem>>, vector<128x128xf32>
      tpu.vector_store %arg9[%c0_19, %c0_20], %19 {strides = array<i32>} : memref<128x128xf32, #tpu.memory_space<vmem>>, vector<128x128xf32>,
    } else {
    }
    %c0 = arith.constant 0 : index
    %c0_1 = arith.constant 0 : index
    %3 = vector.load %arg10[%c0, %c0_1] : memref<128x128xf32, #tpu.memory_space<vmem>>, vector<128x128xf32>
    %c0_2 = arith.constant 0 : index
    %c0_3 = arith.constant 0 : index
    %4 = vector.load %arg2[%c0_2, %c0_3] : memref<128x128xbf16, #tpu.memory_space<vmem>>, vector<128x128xbf16>
    %c0_4 = arith.constant 0 : index
    %c0_5 = arith.constant 0 : index
    %5 = vector.load %arg3[%c0_4, %c0_5] : memref<128x128xbf16, #tpu.memory_space<vmem>>, vector<128x128xbf16>
    %cst = arith.constant dense<0.000000e+00> : vector<128x128xf32>
    %6 = tpu.matmul %4, %5, %cst {dimension_numbers = #tpu.dot_dimension_numbers<[1], [0], [0], [1], [0, 0, 1, 1], [], []>} : vector<128x128xbf16>, vector<128x128xbf16>, vector<128x128xf32> -> vector<128x128xf32>
    %7 = arith.addf %3, %6 : vector<128x128xf32>
    %c0_6 = arith.constant 0 : index
    %c0_7 = arith.constant 0 : index
    %8 = vector.load %arg10[%c0_6, %c0_7] : memref<128x128xf32, #tpu.memory_space<vmem>>, vector<128x128xf32>
    tpu.vector_store %arg10[%c0_6, %c0_7], %7 {strides = array<i32>} : memref<128x128xf32, #tpu.memory_space<vmem>>, vector<128x128xf32>,
    %c1_i32 = arith.constant 1 : i32
    %9 = arith.cmpi eq, %arg1, %c1_i32 : i32
    %10 = arith.extui %9 : i1 to i32
    %c0_i32_8 = arith.constant 0 : i32
    %11 = arith.cmpi ne, %10, %c0_i32_8 : i32
    scf.if %11 {
      %c0_9 = arith.constant 0 : index
      %c0_10 = arith.constant 0 : index
      %12 = vector.load %arg10[%c0_9, %c0_10] : memref<128x128xf32, #tpu.memory_space<vmem>>, vector<128x128xf32>
      %13 = arith.truncf %12 : vector<128x128xf32> to vector<128x128xbf16>
      %c0_11 = arith.constant 0 : index
      %c0_12 = arith.constant 0 : index
      %14 = vector.load %arg9[%c0_11, %c0_12] : memref<128x128xf32, #tpu.memory_space<vmem>>, vector<128x128xf32>
      %c0_13 = arith.constant 0 : index
      %c0_14 = arith.constant 0 : index
      %15 = vector.load %arg6[%c0_13, %c0_14] : memref<128x128xbf16, #tpu.memory_space<vmem>>, vector<128x128xbf16>
      %cst_15 = arith.constant dense<0.000000e+00> : vector<128x128xf32>
      %16 = tpu.matmul %13, %15, %cst_15 {dimension_numbers = #tpu.dot_dimension_numbers<[1], [0], [0], [1], [0, 0, 1, 1], [], []>} : vector<128x128xbf16>, vector<128x128xbf16>, vector<128x128xf32> -> vector<128x128xf32>
      %17 = arith.addf %14, %16 : vector<128x128xf32>
      %cst_16 = arith.constant 0.000000e+00 : f32
      %18 = vector.broadcast %cst_16 : f32 to vector<128x128xf32>
      %19 = arith.maximumf %17, %18 : vector<128x128xf32>
      %20 = arith.truncf %19 : vector<128x128xf32> to vector<128x128xbf16>
      %c0_17 = arith.constant 0 : index
      %c0_18 = arith.constant 0 : index
      %21 = vector.load %arg8[%c0_17, %c0_18] : memref<128x128xbf16, #tpu.memory_space<vmem>>, vector<128x128xbf16>
      tpu.vector_store %arg8[%c0_17, %c0_18], %20 {strides = array<i32>} : memref<128x128xbf16, #tpu.memory_space<vmem>>, vector<128x128xbf16>,
    } else {
    }
    return
  }
  func.func @transform_0(%arg0: i32, %arg1: i32) -> (i32, i32) {
    %c0_i32 = arith.constant 0 : i32
    return %arg0, %arg1 : i32, i32
  }
  func.func @transform_1(%arg0: i32, %arg1: i32) -> (i32, i32) {
    %c0_i32 = arith.constant 0 : i32
    %c0_i32_0 = arith.constant 0 : i32
    return %arg1, %c0_i32 : i32, i32
  }
  func.func @transform_2(%arg0: i32, %arg1: i32) -> (i32, i32) {
    %c0_i32 = arith.constant 0 : i32
    %c0_i32_0 = arith.constant 0 : i32
    return %arg0, %c0_i32 : i32, i32
  }
  func.func @transform_3(%arg0: i32, %arg1: i32) -> (i32, i32) {
    %c0_i32 = arith.constant 0 : i32
    %c0_i32_0 = arith.constant 0 : i32
    %c0_i32_1 = arith.constant 0 : i32
    return %c0_i32, %c0_i32_0 : i32, i32
  }
  func.func @transform_4(%arg0: i32, %arg1: i32) -> (i32, i32) {
    %c0_i32 = arith.constant 0 : i32
    %c0_i32_0 = arith.constant 0 : i32
    %c0_i32_1 = arith.constant 0 : i32
    return %c0_i32, %c0_i32_0 : i32, i32
  }
  func.func @transform_5(%arg0: i32, %arg1: i32) -> (i32, i32) {
    %c0_i32 = arith.constant 0 : i32
    %c0_i32_0 = arith.constant 0 : i32
    %c0_i32_1 = arith.constant 0 : i32
    return %c0_i32, %c0_i32_0 : i32, i32
  }
  func.func @transform_6(%arg0: i32, %arg1: i32) -> (i32, i32) {
    %c0_i32 = arith.constant 0 : i32
    %c0_i32_0 = arith.constant 0 : i32
    return %arg0, %c0_i32 : i32, i32
  }
}

</mosaic_0001>

<bundles_post_ra>
// kernel: tpu_custom_call.1
= control target key start
LH: loop header
LB: loop body
LE: loop exit
PB: predicated region body
PF: predicated region fallthrough
CT: control target
= control target key end

     0   :  { %s2848_s0 = inlined_call_operand.hbm [shape: bf16[256,256], index: 0, kind: input, shape index: {}]   ;;  %s2849_s1 = inlined_call_operand.hbm [shape: bf16[256,128], index: 1, kind: input, shape index: {}]   ;;  %s2850_s2 = inlined_call_operand.hbm [shape: bf16[256,128], index: 2, kind: input, shape index: {}]   ;;  %s2851_s3 = inlined_call_operand.hbm [shape: bf16[128,128], index: 3, kind: input, shape index: {}]   ;;  %s2852_s4 = inlined_call_operand.hbm [shape: bf16[128,128], index: 4, kind: input, shape index: {}]   ;;  %s2853_s5 = inlined_call_operand.vmem [shape: f32[1,128], index: 5, kind: input, shape index: {}]   ;;  %s2854_s6 = inlined_call_operand.hbm [shape: bf16[256,128], index: 6, kind: output, shape index: {}]  }
   0x1   :  { %2874 = sst [smem:[#allocation27_spill]] %s2848_s0 }
   0x2   :  { %2875 = sst [smem:[#allocation28_spill]] %s2849_s1 }
   0x3   :  { %2876 = sst [smem:[#allocation29_spill]] %s2851_s3 }
   0x4   :  { %2877 = sst [smem:[#allocation30_spill]] %s2853_s5 }
   0x5   :  { %2878 = sst [smem:[#allocation31_spill]] %s2854_s6 }
   0x6   :  { %11 = vsyncpa [#allocation5], 0 }
   0x7   :  { %13 = vsyncpa [#allocation5 + $0x1], 0 }
   0x8   :  { %14 = vsyncpa [#allocation8], 0 }
   0x9   :  { %16 = vsyncpa [#allocation8 + $0x1], 0 }
   0xa   :  { %17 = vsyncpa [#allocation11], 0 }
   0xb   :  { %18 = vsyncpa [#allocation6], 0 }
   0xc   :  { %20 = vsyncpa [#allocation6 + $0x1], 0  ;;  %s2319_s21 = smov 0   ;;  %s2321_s22 = smov 0  }
   0xd   :  { %s2323_s23 = smov 0   ;;  %s2325_s24 = smov 0  }
   0xe   :  { %s2327_s25 = smov 0   ;;  %s2329_s26 = smov 0  }
   0xf   :  { %s2331_s27 = smov 0   ;;  %s2333_s28 = smov 0  }
  0x10   :  { %s2335_s29 = smov 0   ;;  %s2337_s30 = smov 0  }
  0x11   :  { %s2339_s7 = smov 0   ;;  %s2341_s8 = smov 0  }
  0x12   :  { %s2343_s9 = smov 0   ;;  %s2345_s10 = smov 0  }
  0x13 LB: > { %2879 = sst [smem:[#allocation19_spill]] %s2234_s25  ;;  %s2390_s11 = sadd.s32 4294967295, %s2270_s10   ;;  %s2270_s10 = sphi %s2345_s10, %s26_s10   ;;  %s2266_s9 = sphi %s2343_s9, %s2948_s9   ;;  %s2262_s8 = sphi %s2341_s8, %s2947_s8   ;;  %s2258_s7 = sphi %s2339_s7, %s2946_s7   ;;  %s2254_s30 = sphi %s2337_s30, %s2945_s30   ;;  %s2250_s29 = sphi %s2335_s29, %s2944_s29   ;;  %s2246_s28 = sphi %s2333_s28, %s2943_s28   ;;  %s2242_s27 = sphi %s2331_s27, %s2942_s27   ;;  %s2238_s26 = sphi %s2329_s26, %s2941_s26   ;;  %s2234_s25 = sphi %s2327_s25, %s2933_s25   ;;  %s2230_s24 = sphi %s2325_s24, %s2940_s24   ;;  %s2226_s23 = sphi %s2323_s23, %s2939_s23   ;;  %s2222_s22 = sphi %s2321_s22, %s2938_s22   ;;  %s2218_s21 = sphi %s2319_s21, %s2937_s21  }
  0x14   : > { %2880 = sst [smem:[#allocation20_spill]] %s2238_s26  ;;  %p1419_p0 = scmp.ge.s32.totalorder %s2270_s10, 1 }
  0x15   : > { %2881 = sst [smem:[#allocation21_spill]] %s2254_s30  ;;  %p2856_p1 = scmp.eq.s32.totalorder %s2390_s11, 0 }
  0x16   : > { %2882 = sst [smem:[#allocation22_spill]] %s2258_s7  ;;  %p212_p3 = scmp.lt.s32.totalorder %s2270_s10, 5 }
  0x17   : > { %s2272_s13 = smov [#allocation10]   ;;  %s2885_s3 = sld [smem:[#allocation29_spill]] }
  0x18   : > { %p2396_p4 = pnand %p1419_p0, %p212_p3  ;;  %s224_s14 = sshll.u32 %s2272_s13, 4  ;;  %s225_s14 = int_to_ptr.vmem [resolvable:$true] %s224_s14 }
  0x1a   : > { %s2883_s12 = scalar_select %p2396_p4, 1, 0 }
  0x1b   : > { %p1779_p5 = pneg %p2396_p4 }
  0x1d   : > { %p2404_p6 = pnand %p1779_p5, %p2856_p1  ;;  %s1966_s18 = scalar_lea.hbm %s2885_s3, 1024 }
  0x1e   : > { %p1967_p7 = scmp.ne.s32.totalorder %s2885_s3, %s1966_s18  ;;  %p1973_p11 = scmp.lt.u32.totalorder %s1966_s18, %s2885_s3 }
  0x1f   : > { %p2870_p8 = pneg %p2404_p6 }
  0x21   : > { %p1969_p9 = pnand %p2870_p8, %p1967_p7 }
  0x23   : > { %p1970_p10 = pneg %p1969_p9 }
  0x25   : > { %p1975_p12 = pnand %p1973_p11, %p1970_p10 }
  0x27   : > { %1978 = shalt.err (!%p1975_p12)
}
  0x28   : > { %s1979_s16 = scalar_lea.vmem %s225_s14, 1024  ;;  %p1987_p5 = scmp.lt.s32.totalorder %s225_s14, %s225_s14 }
  0x29   : > { %p1980_p13 = scmp.ne.s32.totalorder %s225_s14, %s1979_s16  ;;  %p1988_p2 = scmp.lt.s32.totalorder %s1979_s16, %s1979_s16 }
  0x2b   : > { %p1982_p0 = pnand %p1980_p13, %p2870_p8  ;;  %p1989_p1 = por %p1988_p2, %p1987_p5 }
  0x2d   : > { %p1983_p3 = pneg %p1982_p0 }
  0x2f   : > { %p1990_p4 = pnand %p1989_p1, %p1983_p3 }
  0x31   : > { %1993 = shalt.err (!%p1990_p4)
}
  0x32   : > { %s2858_s17 = smov 64   ;;  %s2860_s6 = smov 4  }
  0x33   : > { %1782 = dma.hbm_to_vmem [thread:$0]  (!%p2404_p6), %s2885_s3, 1024, %s225_s14, [#allocation11], %s2858_s17, %s2858_s17, %s2860_s6  }
  0x34   : > { %s35_s20 = sadd.s32 1, %s2262_s8  ;;  %s38_s13 = sadd.s32 1, %s2266_s9 }
  0x35   : > { %p36_p1 = scmp.ge.s32.totalorder %s35_s20, 2  ;;  %p2869_p2 = scmp.eq.s32.totalorder %s2270_s10, 0 }
  0x36   : > { %s73_s16 = sadd.s32 1, %s2238_s26  ;;  %p80_p4 = scmp.ne.s32.totalorder %s2238_s26, %s2234_s25 }
  0x37   : > { %s2950_s20 = smov (%p36_p1, %s35_s20), 0  ;;  %s2952_s13 = smov (!%p36_p1, %s38_s13), %s2266_s9 }
  0x38   : > { %2886 = sst [smem:[#allocation23_spill]] %s2950_s20  ;;  %s43_s7 = ssub.s32 %s2262_s8, %s2950_s20 }
  0x39   : > { %p2446_p7 = por %p80_p4, %p2869_p2  ;;  %p40_p9 = scmp.ge.s32.totalorder %s2952_s13, 2 }
  0x3a   : > { %p71_p10 = scmp.eq.s32.totalorder %s43_s7, 0  ;;  %p86_p11 = scmp.ne.s32.totalorder %s2234_s25, %s2230_s24 }
  0x3b   : > { %p2868_p12 = scmp.lt.s32.totalorder %s2270_s10, 4  ;;  %s2954_s13 = smov (%p40_p9, %s2952_s13), 0 }
  0x3c   : > { %2888 = sst [smem:[#allocation24_spill]] %s2954_s13  ;;  %s2460_s19 = ssub.s32 %s2266_s9, %s2954_s13 }
  0x3d   : > { %s2456_s18 = scalar_select %p71_p10, %s2238_s26, %s73_s16  }
  0x3e   : > { %p2890_p13 = scmp.eq.s32.totalorder %s2390_s11, 0  ;;  %s44_s6 = sor.u32 %s43_s7, %s2460_s19 }
  0x3f   : > { %2889 = sst [smem:[#allocation25_spill]] %s2456_s18  ;;  %p2470_p5 = scmp.eq.s32.totalorder %s44_s6, 0 }
  0x40   : > { %p2464_p0 = por %p86_p11, %p2890_p13  ;;  %s277_s3 = sand.u32 1, %s2270_s10  }
  0x41   : > { %s2893_s24 = scalar_select %p2470_p5, 1, 0 }
  0x42   : > { %s2891_s17 = scalar_select %p2464_p0, 1, 0 }
  0x43   : > { %s279_s20 = sand.u32 1, %s2238_s26   ;;  %s1505_s16 = sshll.u32 %s2262_s8, 10 }
  0x44   : > { %2892 = sst [smem:[#allocation26_spill]] %s2891_s17  ;;  %s1427_s5 = sshll.u32 %s279_s20, 6 }
  0x45   : > { %s2894_s1 = sld [smem:[#allocation28_spill]]  ;;  %s281_s25 = scalar_lea.vmem [#allocation7], %s1427_s5 }
  0x46   : > { %s288_s7 = sshll.u32 %s281_s25, 4  ;;  %p2486_p1 = pnand %p2868_p12, %p2446_p7  ;;  %s2490_s7 = int_to_ptr.vmem [resolvable:$true] %s288_s7 }
  0x47   : > { %s2275_s20 = smov [#allocation12]   ;;  %s2494_s18 = scalar_lea.sflag [#allocation8], %s277_s3 }
  0x48   : > { %s2492_s13 = sshll.u32 %s2275_s20, 4  ;;  %p1996_p9 = pneg %p2486_p1  ;;  %s238_s13 = int_to_ptr.vmem [resolvable:$true] %s2492_s13 }
  0x4b   : > { %s2480_s30 = scalar_lea.hbm %s2894_s1, %s1505_s16  ;;  %s1999_s14 = scalar_lea.hbm %s2894_s1, 2048 }
  0x4c   : > { %s1994_s16 = scalar_lea.hbm %s2480_s30, 1024  ;;  %p2000_p11 = scmp.lt.u32.totalorder %s2480_s30, %s2894_s1 }
  0x4d   : > { %p1995_p4 = scmp.ne.s32.totalorder %s2480_s30, %s1994_s16  ;;  %p2001_p13 = scmp.lt.u32.totalorder %s1999_s14, %s1994_s16 }
  0x4e   : > { %p2003_p12 = scmp.lt.u32.totalorder %s1994_s16, %s2480_s30 }
  0x4f   : > { %p1997_p10 = pnand %p1996_p9, %p1995_p4  ;;  %p2002_p3 = por %p2001_p13, %p2000_p11 }
  0x51   : > { %p1998_p7 = pneg %p1997_p10  ;;  %p2004_p2 = por %p2003_p12, %p2002_p3 }
  0x53   : > { %p2005_p8 = pnand %p2004_p2, %p1998_p7 }
  0x55   : > { %2008 = shalt.err (!%p2005_p8)
}
  0x56   : > { %s2009_s3 = scalar_lea.vmem %s2490_s7, 1024  ;;  %s2276_s20 = smov [#allocation7]  }
  0x57   : > { %p2010_p4 = scmp.ne.s32.totalorder %s2490_s7, %s2009_s3  ;;  %s2014_s5 = sshll.u32 %s2276_s20, 4  ;;  %s2015_s5 = int_to_ptr.vmem [resolvable:$false] %s2014_s5 }
  0x58   : > { %s2016_s26 = scalar_lea.vmem %s2015_s5, 2048  ;;  %p2017_p5 = scmp.lt.s32.totalorder %s2490_s7, %s2015_s5 }
  0x59   : > { %p2012_p10 = pnand %p2010_p4, %p1996_p9  ;;  %p2018_p11 = scmp.lt.s32.totalorder %s2016_s26, %s2009_s3 }
  0x5b   : > { %p2013_p0 = pneg %p2012_p10  ;;  %p2019_p13 = por %p2018_p11, %p2017_p5 }
  0x5d   : > { %p2020_p12 = pnand %p2019_p13, %p2013_p0 }
  0x5f   : > { %2023 = shalt.err (!%p2020_p12)
}
  0x60   : > { %s2896_s17 = smov 4   ;;  %s2897_s16 = smov 64  }
  0x61   : > { %1792 = dma.hbm_to_vmem [thread:$0]  (!%p2486_p1), %s2480_s30, 1024, %s2490_s7, %s2494_s18, %s2897_s16, %s2897_s16, %s2896_s17  }
  0x62   : > { %s2024_s20 = scalar_lea.hbm %s2852_s4, 1024  ;;  %p2898_p2 = pneg %p2404_p6 }
  0x63   : > { %p2025_p8 = scmp.ne.s32.totalorder %s2852_s4, %s2024_s20  ;;  %p2031_p5 = scmp.lt.u32.totalorder %s2024_s20, %s2852_s4 }
  0x65   : > { %p2027_p0 = pnand %p2025_p8, %p2898_p2 }
  0x67   : > { %p2028_p3 = pneg %p2027_p0 }
  0x69   : > { %p2033_p9 = pnand %p2031_p5, %p2028_p3 }
  0x6b   : > { %2036 = shalt.err (!%p2033_p9)
}
  0x6c   : > { %s2037_s30 = scalar_lea.vmem %s238_s13, 1024  ;;  %p2899_p7 = pmov %p2898_p2 }
  0x6d   : > { %p2038_p1 = scmp.ne.s32.totalorder %s238_s13, %s2037_s30  ;;  %p2045_p11 = scmp.lt.s32.totalorder %s238_s13, %s238_s13 }
  0x6e   : > { %p2046_p13 = scmp.lt.s32.totalorder %s2037_s30, %s2037_s30 }
  0x6f   : > { %p2040_p4 = pnand %p2038_p1, %p2899_p7 }
  0x70   : > { %p2047_p12 = por %p2046_p13, %p2045_p11 }
  0x71   : > { %p2041_p10 = pneg %p2040_p4 }
  0x73   : > { %p2048_p2 = pnand %p2047_p12, %p2041_p10 }
  0x75   : > { %2051 = shalt.err (!%p2048_p2)
}
  0x76   : > { %1785 = dma.hbm_to_vmem [thread:$0]  (!%p2404_p6), %s2852_s4, 1024, %s238_s13, [#allocation11], %s2897_s16, %s2897_s16, %s2896_s17  }
  0x77   : > { %s47_s15 = sadd.s32 1, %s2250_s29  ;;  %p2900_p8 = scmp.ne.s32.totalorder %s2893_s24, 0 }
  0x78   : > { %p54_p0 = scmp.ne.s32.totalorder %s2250_s29, %s2246_s28  ;;  %p60_p3 = scmp.ne.s32.totalorder %s2246_s28, %s2242_s27 }
  0x79   : > { %s2553_s14 = scalar_select %p2900_p8, %s2250_s29, %s47_s15  }
  0x7a   : > { %s254_s20 = sand.u32 1, %s2250_s29   ;;  %s1504_s3 = sshll.u32 %s2266_s9, 5 }
  0x7b   : > { %p2901_p5 = scmp.eq.s32.totalorder %s2270_s10, 0  ;;  %p2902_p1 = scmp.eq.s32.totalorder %s2390_s11, 0 }
  0x7c   : > { %s1423_s6 = sshll.u32 %s254_s20, 6  ;;  %s264_s26 = sadd.s32 %s2262_s8, %s1504_s3 }
  0x7d   : > { %p56_p9 = por %p2901_p5, %p54_p0  ;;  %p2565_p7 = por %p2902_p1, %p60_p3 }
  0x7e   : > { %s1426_s30 = sshll.u32 %s264_s26, 6  ;;  %s258_s13 = scalar_lea.vmem [#allocation4], %s1423_s6 }
  0x7f   : > { %s267_s7 = sshll.u32 %s258_s13, 4  ;;  %s2904_s0 = sld [smem:[#allocation27_spill]]  ;;  %s2575_s7 = int_to_ptr.vmem [resolvable:$true] %s267_s7 }
  0x80   : > { %p2905_p6 = scmp.lt.s32.totalorder %s2270_s10, 4  ;;  %s2583_s3 = scalar_lea.sflag [#allocation5], %s254_s20 }
  0x82   : > { %p2579_p4 = pnand %p2905_p6, %p56_p9 }
  0x84   : > { %p2054_p11 = pneg %p2579_p4 }
  0x85   : > { %s2573_s15 = scalar_lea.hbm %s2904_s0, %s1426_s30  ;;  %s2057_s13 = scalar_lea.hbm %s2904_s0, 4096 }
  0x86   : > { %s2052_s6 = scalar_lea.hbm %s2573_s15, 1024  ;;  %p2058_p2 = scmp.lt.u32.totalorder %s2573_s15, %s2904_s0 }
  0x87   : > { %p2053_p10 = scmp.ne.s32.totalorder %s2573_s15, %s2052_s6  ;;  %p2059_p8 = scmp.lt.u32.totalorder %s2057_s13, %s2052_s6 }
  0x88   : > { %p2061_p3 = scmp.lt.u32.totalorder %s2052_s6, %s2573_s15 }
  0x89   : > { %p2055_p13 = pnand %p2054_p11, %p2053_p10  ;;  %p2060_p0 = por %p2059_p8, %p2058_p2 }
  0x8b   : > { %p2056_p12 = pneg %p2055_p13  ;;  %p2062_p5 = por %p2061_p3, %p2060_p0 }
  0x8d   : > { %p2063_p9 = pnand %p2062_p5, %p2056_p12 }
  0x8f   : > { %2066 = shalt.err (!%p2063_p9)
}
  0x90   : > { %s2067_s20 = scalar_lea.vmem %s2575_s7, 1024  ;;  %s2277_s26 = smov [#allocation4]  }
  0x91   : > { %p2068_p1 = scmp.ne.s32.totalorder %s2575_s7, %s2067_s20  ;;  %s2072_s30 = sshll.u32 %s2277_s26, 4  ;;  %s2073_s30 = int_to_ptr.vmem [resolvable:$false] %s2072_s30 }
  0x92   : > { %s2074_s25 = scalar_lea.vmem %s2073_s30, 2048  ;;  %p2075_p13 = scmp.lt.s32.totalorder %s2575_s7, %s2073_s30 }
  0x93   : > { %p2070_p6 = pnand %p2068_p1, %p2054_p11  ;;  %p2076_p2 = scmp.lt.s32.totalorder %s2074_s25, %s2067_s20 }
  0x95   : > { %p2071_p10 = pneg %p2070_p6  ;;  %p2077_p8 = por %p2076_p2, %p2075_p13 }
  0x97   : > { %p2078_p0 = pnand %p2077_p8, %p2071_p10 }
  0x99   : > { %2081 = shalt.err (!%p2078_p0)
}
  0x9a   : > { %s2278_s6 = smov 128   ;;  %s1418_s27 = sadd.s32 4294967294, %s2270_s10  }
  0x9b   : > { %1789 = dma.hbm_to_vmem [thread:$0]  (!%p2579_p4), %s2573_s15, 1024, %s2575_s7, %s2583_s3, %s2278_s6, %s2897_s16, %s2896_s17  }
  0x9c   : > { %s99_s13 = sadd.s32 1, %s2226_s23  ;;  %p106_p11 = scmp.ne.s32.totalorder %s2226_s23, %s2222_s22 }
  0x9d   : > { %p2907_p12 = scmp.eq.s32.totalorder %s2460_s19, 0  ;;  %p2908_p3 = scmp.eq.s32.totalorder %s2270_s10, 0 }
  0x9e   : > { %p112_p9 = scmp.ne.s32.totalorder %s2222_s22, %s2218_s21  ;;  %p2910_p1 = scmp.eq.s32.totalorder %s2390_s11, 3 }
  0x9f   : > { %s2620_s24 = scalar_select %p2907_p12, %s2226_s23, %s99_s13  }
  0xa0   : > { %p2624_p5 = por %p106_p11, %p2908_p3  ;;  %p2632_p6 = por %p2910_p1, %p106_p11 }
  0xa1   : > { %p205_p4 = scmp.eq.s32.totalorder %s1418_s27, 3  ;;  %p2912_p10 = scmp.eq.s32.totalorder %s2390_s11, 0 }
  0xa2   : > { %s2911_s26 = scalar_select %p2632_p6, 1, 0 }
  0xa3   : > { %p2638_p13 = por %p112_p9, %p2912_p10  ;;  %s300_s19 = sand.u32 1, %s2226_s23  }
  0xa4   : > { %p2643_p2 = por %p205_p4, %p112_p9  ;;  %s1430_s3 = sshll.u32 %s300_s19, 6 }
  0xa5   : > { %s2913_s7 = scalar_select %p2638_p13, 1, 0 }
  0xa6   : > { %s2914_s15 = scalar_select %p2643_p2, 1, 0 }
  0xa7   : > { %s1506_s30 = sshll.u32 %s2266_s9, 10  ;;  %s302_s27 = scalar_lea.vmem [#allocation9], %s1430_s3 }
  0xa8   : > { %s2651_s13 = scalar_lea.hbm %s2850_s2, %s1506_s30  ;;  %s309_s0 = sshll.u32 %s302_s27, 4  ;;  %s2653_s0 = int_to_ptr.vmem [resolvable:$true] %s309_s0 }
  0xa9   : > { %p2915_p8 = scmp.lt.s32.totalorder %s2270_s10, 4  ;;  %s2082_s19 = scalar_lea.hbm %s2651_s13, 1024 }
  0xaa   : > { %p2083_p11 = scmp.ne.s32.totalorder %s2651_s13, %s2082_s19  ;;  %s2087_s25 = scalar_lea.hbm %s2850_s2, 2048 }
  0xab   : > { %p2659_p0 = pnand %p2915_p8, %p2624_p5  ;;  %p2088_p5 = scmp.lt.u32.totalorder %s2651_s13, %s2850_s2 }
  0xac   : > { %p2089_p1 = scmp.lt.u32.totalorder %s2087_s25, %s2082_s19  ;;  %p2091_p10 = scmp.lt.u32.totalorder %s2082_s19, %s2651_s13 }
  0xad   : > { %p2084_p12 = pneg %p2659_p0 }
  0xae   : > { %p2090_p4 = por %p2089_p1, %p2088_p5 }
  0xaf   : > { %p2085_p3 = pnand %p2084_p12, %p2083_p11 }
  0xb0   : > { %p2092_p8 = por %p2091_p10, %p2090_p4 }
  0xb1   : > { %p2086_p9 = pneg %p2085_p3 }
  0xb3   : > { %p2093_p2 = pnand %p2092_p8, %p2086_p9 }
  0xb5   : > { %2096 = shalt.err (!%p2093_p2)
}
  0xb6   : > { %s2097_s27 = scalar_lea.vmem %s2653_s0, 1024  ;;  %s2279_s3 = smov [#allocation9]  }
  0xb7   : > { %p2098_p11 = scmp.ne.s32.totalorder %s2653_s0, %s2097_s27  ;;  %s2102_s30 = sshll.u32 %s2279_s3, 4  ;;  %s2103_s30 = int_to_ptr.vmem [resolvable:$false] %s2102_s30 }
  0xb8   : > { %s2104_s20 = scalar_lea.vmem %s2103_s30, 2048  ;;  %p2105_p13 = scmp.lt.s32.totalorder %s2653_s0, %s2103_s30 }
  0xb9   : > { %p2100_p3 = pnand %p2098_p11, %p2084_p12  ;;  %p2106_p5 = scmp.lt.s32.totalorder %s2104_s20, %s2097_s27 }
  0xbb   : > { %p2101_p6 = pneg %p2100_p3  ;;  %p2107_p1 = por %p2106_p5, %p2105_p13 }
  0xbd   : > { %p2108_p4 = pnand %p2107_p1, %p2101_p6 }
  0xbf   : > { %2111 = shalt.err (!%p2108_p4)
}
  0xc0   : > { %1795 = dma.hbm_to_vmem [thread:$0]  (!%p2659_p0), %s2651_s13, 1024, %s2653_s0, %s2494_s18, %s2897_s16, %s2897_s16, %s2896_s17  }
  0xc1   : > { %p2917_p2 = scmp.ne.s32.totalorder %s2883_s12, 0 }
  0xc2   : > { %s323_s19 = sand.u32 (!%p2917_p2), 1, %s2246_s28  }
  0xc3   : > { %321 = sbr.rel (%p2917_p2) target bundleno = 1006 (0x3ee), region = 44  ;;  %s1434_s25 = sshll.u32 (!%p2917_p2), %s323_s19, 6 }
  0xc4   : > { %s324_s6 = scalar_lea.sflag (!%p2917_p2), [#allocation5], %s323_s19  ;;  %s2695_s27 = scalar_lea.vmem (!%p2917_p2), [#allocation4], %s1434_s25 }
  0xca   : > { %2197 = dma.done.wait (%p2565_p7), %s324_s6, 1024  }
  0xcb   : > { %2199 = vsyncadd (%p2565_p7), %s324_s6, 4294966272  ;;  %s2918_s1 = sld [smem:[#allocation19_spill]]  ;;  %s2919_s3 = sld [smem:[#allocation26_spill]] }
  0xcc   : > { %s332_s30 = sand.u32 1, %s2390_s11  }
  0xcd   : > { %s333_s12 = scalar_lea.sflag [#allocation8], %s332_s30 }
  0xd1   : > { %s334_s0 = sand.u32 1, %s2918_s1   ;;  %p2920_p6 = scmp.ne.s32.totalorder %s2919_s3, 0 }
  0xd2   : > { %s1435_s18 = sshll.u32 %s334_s0, 6 }
  0xd3   : > { %s2703_s17 = scalar_lea.vmem [#allocation7], %s1435_s18 }
  0xd4   : > { %2201 = dma.done.wait (%p2920_p6), %s333_s12, 1024  }
  0xd5   : > { %2203 = vsyncadd (%p2920_p6), %s333_s12, 4294966272  ;;  %s343_s16 = sand.u32 1, %s2222_s22   ;;  %p2921_p7 = scmp.ne.s32.totalorder %s2913_s7, 0 }
  0xd6   : > { %s1436_s5 = sshll.u32 %s343_s16, 6 }
  0xd7   : > { %s2712_s13 = scalar_lea.vmem [#allocation9], %s1436_s5 }
  0xd8   : > { %2205 = dma.done.wait (%p2921_p7), %s333_s12, 1024  }
  0xd9   : > { %2207 = vsyncadd (%p2921_p7), %s333_s12, 4294966272  ;;  %p2922_p13 = scmp.eq.s32.totalorder %s2390_s11, 0 }
  0xdb   : > { %2209 = dma.done.wait (%p2922_p13), [#allocation11], 2048   ;;  %p2923_p0 = pmov %p2922_p13 }
  0xdc   : > { %s2722_s20 = scalar_lea.vmem [#allocation13], %s1436_s5  ;;  %s2924_s19 = sld [smem:[#allocation21_spill]] }
  0xdd   : > { %2211 = vsyncadd (%p2923_p0), [#allocation11], 4294965248 }
  0xe2   : > { %p1440_p12 = scmp.ne.s32.totalorder %s2924_s19, 0 }
  0xe3   : > { %v1926_v0 = vld [vmem:[#allocation10] sm:$0xff] (!%p1440_p12)   ;;  %v2280_v1 = vmov (!%p1440_p12), 0.0   ;;  %v1927_v2 = vld [vmem:[#allocation10 + $0x8] sm:$0xff] (!%p1440_p12)   ;;  %v1928_v3 = vld [vmem:[#allocation10 + $0x10] sm:$0xff] (!%p1440_p12)   ;;  %s2925_s25 = sld [smem:[#allocation30_spill]] (!%p1440_p12) }
  0xe4   : > { %400 = sbr.rel (%p1440_p12) target bundleno = 486 (0x1e6), region = 68  ;;  %401 = vst [vmem:[#allocation3] sm:$0xff] (!%p1440_p12), %v2280_v1  ;;  %402 = vst [vmem:[#allocation3 + $0x8] sm:$0xff] (!%p1440_p12), %v2280_v1  ;;  %1619 = vmatprep.subr.bf16.mxu0 (!%p1440_p12), %v1926_v0  ;;  %1715 = vmatprep.subr.bf16.mxu1 (!%p1440_p12), %v1926_v0  ;;  %v1929_v4 = vld [vmem:[#allocation10 + $0x18] sm:$0xff] (!%p1440_p12)   ;;  %v1934_v5 = vld [vmem:[%s2712_s13] sm:$0xff] (!%p1440_p12)  }
  0xe5   : > { %403 = vst [vmem:[#allocation3 + $0x10] sm:$0xff] (!%p1440_p12), %v2280_v1  ;;  %404 = vst [vmem:[#allocation3 + $0x18] sm:$0xff] (!%p1440_p12), %v2280_v1  ;;  %1620 = vmatpush3.bf16.msra.mxu0 (!%p1440_p12), %v1926_v0  ;;  %1723 = vmatpush3.bf16.msra.mxu1 (!%p1440_p12), %v1926_v0  ;;  %v1935_v6 = vld [vmem:[%s2712_s13 + $0x20] sm:$0xff] (!%p1440_p12)   ;;  %v1931_v8 = vld [vmem:[#allocation10 + $0x28] sm:$0xff] (!%p1440_p12)  }
  0xe6   : > { %405 = vst [vmem:[#allocation3 + $0x20] sm:$0xff] (!%p1440_p12), %v2280_v1  ;;  %406 = vst [vmem:[#allocation3 + $0x28] sm:$0xff] (!%p1440_p12), %v2280_v1  ;;  %1621 = vmatprep.subr.bf16.mxu0 (!%p1440_p12), %v1927_v2  ;;  %1716 = vmatprep.subr.bf16.mxu1 (!%p1440_p12), %v1927_v2  ;;  %v1930_v7 = vld [vmem:[#allocation10 + $0x20] sm:$0xff] (!%p1440_p12)   ;;  %v1932_v9 = vld [vmem:[#allocation10 + $0x30] sm:$0xff] (!%p1440_p12)  }
  0xe7   : > { %407 = vst [vmem:[#allocation3 + $0x30] sm:$0xff] (!%p1440_p12), %v2280_v1  ;;  %408 = vst [vmem:[#allocation3 + $0x38] sm:$0xff] (!%p1440_p12), %v2280_v1  ;;  %1635 = vmatprep.mubr.bf16.mxu0 (!%p1440_p12), %v1934_v5  ;;  %1643 = vmatprep.mubr.bf16.mxu1 (!%p1440_p12), %v1935_v6  ;;  %v1933_v10 = vld [vmem:[#allocation10 + $0x38] sm:$0xff] (!%p1440_p12)   ;;  %v1936_v11 = vld [vmem:[%s2712_s13 + $0x8] sm:$0xff] (!%p1440_p12)  }
  0xe8   : > { %409 = vst [vmem:[#allocation3 + $0x40] sm:$0xff] (!%p1440_p12), %v2280_v1  ;;  %410 = vst [vmem:[#allocation3 + $0x48] sm:$0xff] (!%p1440_p12), %v2280_v1  ;;  %v1937_v12 = vld [vmem:[%s2712_s13 + $0x28] sm:$0xff] (!%p1440_p12)   ;;  %v1938_v13 = vld [vmem:[%s2712_s13 + $0x10] sm:$0xff] (!%p1440_p12)  }
  0xe9   : > { %411 = vst [vmem:[#allocation3 + $0x50] sm:$0xff] (!%p1440_p12), %v2280_v1  ;;  %412 = vst [vmem:[#allocation3 + $0x58] sm:$0xff] (!%p1440_p12), %v2280_v1  ;;  %1622 = vmatpush3.bf16.msra.mxu0 (!%p1440_p12), %v1927_v2  ;;  %1724 = vmatpush3.bf16.msra.mxu1 (!%p1440_p12), %v1927_v2  ;;  %v1939_v14 = vld [vmem:[%s2712_s13 + $0x30] sm:$0xff] (!%p1440_p12)   ;;  %v1940_v15 = vld [vmem:[%s2712_s13 + $0x18] sm:$0xff] (!%p1440_p12)  }
  0xea   : > { %413 = vst [vmem:[#allocation3 + $0x60] sm:$0xff] (!%p1440_p12), %v2280_v1  ;;  %414 = vst [vmem:[#allocation3 + $0x68] sm:$0xff] (!%p1440_p12), %v2280_v1  ;;  %1623 = vmatprep.subr.bf16.mxu0 (!%p1440_p12), %v1928_v3  ;;  %1717 = vmatprep.subr.bf16.mxu1 (!%p1440_p12), %v1928_v3  ;;  %v1941_v16 = vld [vmem:[%s2712_s13 + $0x38] sm:$0xff] (!%p1440_p12)   ;;  %v1441_v17 = vld [vmem:[%s2925_s25] ss:$0 sm:$0xff] (!%p1440_p12) }
  0xeb   : > { %415 = vst [vmem:[#allocation3 + $0x70] sm:$0xff] %v2280_v1  ;;  %416 = vst [vmem:[#allocation3 + $0x78] sm:$0xff] %v2280_v1 }
  0xed   : > { %1624 = vmatpush3.bf16.msra.mxu0 %v1928_v3  ;;  %1725 = vmatpush3.bf16.msra.mxu1 %v1928_v3 }
  0xee   : > { %1625 = vmatprep.subr.bf16.mxu0 %v1929_v4  ;;  %1718 = vmatprep.subr.bf16.mxu1 %v1929_v4 }
  0xf1   : > { %1626 = vmatpush3.bf16.msra.mxu0 %v1929_v4  ;;  %1726 = vmatpush3.bf16.msra.mxu1 %v1929_v4 }
  0xf2   : > { %1627 = vmatprep.subr.bf16.mxu0 %v1930_v7  ;;  %1719 = vmatprep.subr.bf16.mxu1 %v1930_v7 }
  0xf5   : > { %1628 = vmatpush3.bf16.msra.mxu0 %v1930_v7  ;;  %1727 = vmatpush3.bf16.msra.mxu1 %v1930_v7 }
  0xf6   : > { %1629 = vmatprep.subr.bf16.mxu0 %v1931_v8  ;;  %1720 = vmatprep.subr.bf16.mxu1 %v1931_v8 }
  0xf9   : > { %1630 = vmatpush3.bf16.msra.mxu0 %v1931_v8  ;;  %1728 = vmatpush3.bf16.msra.mxu1 %v1931_v8 }
  0xfa   : > { %1631 = vmatprep.subr.bf16.mxu0 %v1932_v9  ;;  %1721 = vmatprep.subr.bf16.mxu1 %v1932_v9 }
  0xfd   : > { %1632 = vmatpush3.bf16.msra.mxu0 %v1932_v9  ;;  %1729 = vmatpush3.bf16.msra.mxu1 %v1932_v9 }
  0xfe   : > { %1633 = vmatprep.subr.bf16.mxu0 %v1933_v10  ;;  %1722 = vmatprep.subr.bf16.mxu1 %v1933_v10 }
 0x101   : > { %1634 = vmatpush3.bf16.msra.mxu0 %v1933_v10  ;;  %1730 = vmatpush3.bf16.msra.mxu1 %v1933_v10 }
 0x104   : > { %1636 = vmatmul.mubr.bf16.vlgmr.msra.gmra.mrb[0].mxu0 %v1936_v11  ;;  %1644 = vmatmul.mubr.bf16.vlgmr.msra.gmra.mrb[0].mxu1 %v1937_v12 }
 0x105   : > { %1639 = vmatprep.mubr.bf16.mxu0 %v1938_v13  ;;  %1647 = vmatprep.mubr.bf16.mxu1 %v1939_v14 }
 0x10c   : > { %1640 = vmatmul.mubr.bf16.gmra.mrb[4].mxu0 %v1940_v15  ;;  %1648 = vmatmul.mubr.bf16.gmra.mrb[4].mxu1 %v1941_v16 }
 0x1d7   : > { %v1637_v18 = vpop.f32.mrb[0].mxu0  ;;  %v1645_v19 = vpop.f32.mrb[0].mxu1 }
 0x1d8   : > { %v595_v20 = vadd.f32 %v1637_v18, %v1441_v17  ;;  %v627_v21 = vadd.f32 %v1645_v19, %v1441_v17  ;;  %v586_v22 = vpop.f32.mrb[1].mxu0  ;;  %v618_v23 = vpop.f32.mrb[1].mxu1 }
 0x1d9   : > { %v587_v24 = vadd.f32 %v1441_v17, %v586_v22  ;;  %v619_v25 = vadd.f32 %v1441_v17, %v618_v23  ;;  %v1638_v26 = vpop.f32.mrb[2].mxu0  ;;  %v1646_v27 = vpop.f32.mrb[2].mxu1 }
 0x1da   : > { %651 = vst [vmem:[#allocation2 + $0x10] sm:$0xff] %v595_v20  ;;  %659 = vst [vmem:[#allocation2 + $0x50] sm:$0xff] %v627_v21  ;;  %v598_v28 = vadd.f32 %v1638_v26, %v1441_v17  ;;  %v630_v29 = vadd.f32 %v1646_v27, %v1441_v17  ;;  %v589_v30 = vpop.f32.mrb[3].mxu0  ;;  %v621_v31 = vpop.f32.mrb[3].mxu1 }
 0x1db   : > { %649 = vst [vmem:[#allocation2] sm:$0xff] %v587_v24  ;;  %657 = vst [vmem:[#allocation2 + $0x40] sm:$0xff] %v619_v25  ;;  %v590_v32 = vadd.f32 %v1441_v17, %v589_v30  ;;  %v622_v33 = vadd.f32 %v1441_v17, %v621_v31 }
 0x1dc   : > { %652 = vst [vmem:[#allocation2 + $0x18] sm:$0xff] %v598_v28  ;;  %660 = vst [vmem:[#allocation2 + $0x58] sm:$0xff] %v630_v29 }
 0x1dd   : > { %650 = vst [vmem:[#allocation2 + $0x8] sm:$0xff] %v590_v32  ;;  %658 = vst [vmem:[#allocation2 + $0x48] sm:$0xff] %v622_v33 }
 0x1df   : > { %v1641_v34 = vpop.f32.mrb[4].mxu0  ;;  %v1649_v35 = vpop.f32.mrb[4].mxu1 }
 0x1e0   : > { %v611_v36 = vadd.f32 %v1641_v34, %v1441_v17  ;;  %v643_v37 = vadd.f32 %v1649_v35, %v1441_v17  ;;  %v602_v38 = vpop.f32.mrb[5].mxu0  ;;  %v634_v39 = vpop.f32.mrb[5].mxu1 }
 0x1e1   : > { %v603_v40 = vadd.f32 %v1441_v17, %v602_v38  ;;  %v635_v41 = vadd.f32 %v1441_v17, %v634_v39  ;;  %v1642_v42 = vpop.f32.mrb[6].mxu0  ;;  %v1650_v43 = vpop.f32.mrb[6].mxu1 }
 0x1e2   : > { %655 = vst [vmem:[#allocation2 + $0x30] sm:$0xff] %v611_v36  ;;  %663 = vst [vmem:[#allocation2 + $0x70] sm:$0xff] %v643_v37  ;;  %v614_v44 = vadd.f32 %v1642_v42, %v1441_v17  ;;  %v646_v45 = vadd.f32 %v1650_v43, %v1441_v17  ;;  %v605_v46 = vpop.f32.mrb[7].mxu0  ;;  %v637_v47 = vpop.f32.mrb[7].mxu1 }
 0x1e3   : > { %653 = vst [vmem:[#allocation2 + $0x20] sm:$0xff] %v603_v40  ;;  %661 = vst [vmem:[#allocation2 + $0x60] sm:$0xff] %v635_v41  ;;  %v606_v48 = vadd.f32 %v1441_v17, %v605_v46  ;;  %v638_v49 = vadd.f32 %v1441_v17, %v637_v47 }
 0x1e4   : > { %656 = vst [vmem:[#allocation2 + $0x38] sm:$0xff] %v614_v44  ;;  %664 = vst [vmem:[#allocation2 + $0x78] sm:$0xff] %v646_v45 }
 0x1e5   : > { %654 = vst [vmem:[#allocation2 + $0x28] sm:$0xff] %v606_v48  ;;  %662 = vst [vmem:[#allocation2 + $0x68] sm:$0xff] %v638_v49 }
 0x1e6 PF: > { %v1942_v50 = vld [vmem:[%s2703_s17] sm:$0xff]   ;;  %v1943_v51 = vld [vmem:[%s2703_s17 + $0x8] sm:$0xff]   ;;  %v1944_v52 = vld [vmem:[%s2703_s17 + $0x10] sm:$0xff]   ;;  %s2926_s6 = sld [smem:[#allocation21_spill]] }
 0x1e7   : > { %1651 = vmatprep.subr.bf16.mxu0 %v1942_v50  ;;  %1731 = vmatprep.subr.bf16.mxu1 %v1942_v50  ;;  %v1945_v53 = vld [vmem:[%s2703_s17 + $0x18] sm:$0xff]   ;;  %v1950_v54 = vld [vmem:[%s2695_s27] sm:$0xff]   ;;  %v1947_v57 = vld [vmem:[%s2703_s17 + $0x28] sm:$0xff]  }
 0x1e8   : > { %1652 = vmatpush3.bf16.msra.mxu0 %v1942_v50  ;;  %1739 = vmatpush3.bf16.msra.mxu1 %v1942_v50  ;;  %v1951_v55 = vld [vmem:[%s2695_s27 + $0x20] sm:$0xff]   ;;  %v1948_v58 = vld [vmem:[%s2703_s17 + $0x30] sm:$0xff]   ;;  %v1949_v59 = vld [vmem:[%s2703_s17 + $0x38] sm:$0xff]  }
 0x1e9   : > { %1653 = vmatprep.subr.bf16.mxu0 %v1943_v51  ;;  %1732 = vmatprep.subr.bf16.mxu1 %v1943_v51  ;;  %v1946_v56 = vld [vmem:[%s2703_s17 + $0x20] sm:$0xff]   ;;  %v1952_v60 = vld [vmem:[%s2695_s27 + $0x8] sm:$0xff]   ;;  %v1954_v62 = vld [vmem:[%s2695_s27 + $0x10] sm:$0xff]  }
 0x1ea   : > { %1667 = vmatprep.mubr.bf16.mxu0 %v1950_v54  ;;  %1675 = vmatprep.mubr.bf16.mxu1 %v1951_v55  ;;  %v1953_v61 = vld [vmem:[%s2695_s27 + $0x28] sm:$0xff]   ;;  %v1955_v63 = vld [vmem:[%s2695_s27 + $0x30] sm:$0xff]   ;;  %v1956_v0 = vld [vmem:[%s2695_s27 + $0x18] sm:$0xff]  }
 0x1eb   : > { %v1957_v1 = vld [vmem:[%s2695_s27 + $0x38] sm:$0xff]   ;;  %v667_v2 = vld [vmem:[#allocation3 + $0x10] sm:$0xff]  ;;  %v665_v4 = vld [vmem:[#allocation3] sm:$0xff] }
 0x1ec   : > { %1654 = vmatpush3.bf16.msra.mxu0 %v1943_v51  ;;  %1740 = vmatpush3.bf16.msra.mxu1 %v1943_v51  ;;  %v675_v3 = vld [vmem:[#allocation3 + $0x50] sm:$0xff]  ;;  %v673_v5 = vld [vmem:[#allocation3 + $0x40] sm:$0xff]  ;;  %v668_v8 = vld [vmem:[#allocation3 + $0x18] sm:$0xff]  ;;  %p1474_p9 = scmp.ne.s32.totalorder %s2926_s6, 1 }
 0x1ed   : > { %1655 = vmatprep.subr.bf16.mxu0 %v1944_v52  ;;  %1733 = vmatprep.subr.bf16.mxu1 %v1944_v52  ;;  %v676_v9 = vld [vmem:[#allocation3 + $0x58] sm:$0xff]  ;;  %v666_v14 = vld [vmem:[#allocation3 + $0x8] sm:$0xff]  ;;  %v671_v26 = vld [vmem:[#allocation3 + $0x30] sm:$0xff] }
 0x1ee   : > { %v674_v15 = vld [vmem:[#allocation3 + $0x48] sm:$0xff]  ;;  %v679_v27 = vld [vmem:[#allocation3 + $0x70] sm:$0xff]  ;;  %v669_v28 = vld [vmem:[#allocation3 + $0x20] sm:$0xff] }
 0x1ef   : > { %v677_v29 = vld [vmem:[#allocation3 + $0x60] sm:$0xff]  ;;  %v672_v32 = vld [vmem:[#allocation3 + $0x38] sm:$0xff]  ;;  %v670_v38 = vld [vmem:[#allocation3 + $0x28] sm:$0xff] }
 0x1f0   : > { %1656 = vmatpush3.bf16.msra.mxu0 %v1944_v52  ;;  %1741 = vmatpush3.bf16.msra.mxu1 %v1944_v52  ;;  %v680_v33 = vld [vmem:[#allocation3 + $0x78] sm:$0xff]  ;;  %v678_v39 = vld [vmem:[#allocation3 + $0x68] sm:$0xff]  ;;  %v1958_v50 = vld [vmem:[#allocation12] sm:$0xff] (!%p1474_p9)  }
 0x1f1   : > { %1657 = vmatprep.subr.bf16.mxu0 %v1945_v53  ;;  %1734 = vmatprep.subr.bf16.mxu1 %v1945_v53  ;;  %v1959_v51 = vld [vmem:[#allocation12 + $0x8] sm:$0xff] (!%p1474_p9)   ;;  %v1960_v52 = vld [vmem:[#allocation12 + $0x10] sm:$0xff] (!%p1474_p9)  }
 0x1f4   : > { %1658 = vmatpush3.bf16.msra.mxu0 %v1945_v53  ;;  %1742 = vmatpush3.bf16.msra.mxu1 %v1945_v53  ;;  %v1961_v53 = vld [vmem:[#allocation12 + $0x18] sm:$0xff] (!%p1474_p9)  }
 0x1f5   : > { %1659 = vmatprep.subr.bf16.mxu0 %v1946_v56  ;;  %1735 = vmatprep.subr.bf16.mxu1 %v1946_v56 }
 0x1f8   : > { %1660 = vmatpush3.bf16.msra.mxu0 %v1946_v56  ;;  %1743 = vmatpush3.bf16.msra.mxu1 %v1946_v56 }
 0x1f9   : > { %1661 = vmatprep.subr.bf16.mxu0 %v1947_v57  ;;  %1736 = vmatprep.subr.bf16.mxu1 %v1947_v57 }
 0x1fc   : > { %1662 = vmatpush3.bf16.msra.mxu0 %v1947_v57  ;;  %1744 = vmatpush3.bf16.msra.mxu1 %v1947_v57 }
 0x1fd   : > { %1663 = vmatprep.subr.bf16.mxu0 %v1948_v58  ;;  %1737 = vmatprep.subr.bf16.mxu1 %v1948_v58 }
 0x200   : > { %1664 = vmatpush3.bf16.msra.mxu0 %v1948_v58  ;;  %1745 = vmatpush3.bf16.msra.mxu1 %v1948_v58 }
 0x201   : > { %1665 = vmatprep.subr.bf16.mxu0 %v1949_v59  ;;  %1738 = vmatprep.subr.bf16.mxu1 %v1949_v59 }
 0x204   : > { %1666 = vmatpush3.bf16.msra.mxu0 %v1949_v59  ;;  %1746 = vmatpush3.bf16.msra.mxu1 %v1949_v59 }
 0x205   : > { %1683 = vmatprep.subr.bf16.mxu0 (!%p1474_p9), %v1958_v50  ;;  %1747 = vmatprep.subr.bf16.mxu1 (!%p1474_p9), %v1958_v50 }
 0x207   : > { %1668 = vmatmul.mubr.bf16.vlgmr.msra.gmra.mrb[0].mxu0 %v1952_v60  ;;  %1676 = vmatmul.mubr.bf16.vlgmr.msra.gmra.mrb[0].mxu1 %v1953_v61  ;;  %v1962_v60 = vld [vmem:[#allocation12 + $0x20] sm:$0xff] (!%p1474_p9)   ;;  %v1963_v61 = vld [vmem:[#allocation12 + $0x28] sm:$0xff] (!%p1474_p9)  }
 0x208   : > { %1671 = vmatprep.mubr.bf16.mxu0 %v1954_v62  ;;  %1679 = vmatprep.mubr.bf16.mxu1 %v1955_v63  ;;  %v1964_v62 = vld [vmem:[#allocation12 + $0x30] sm:$0xff] (!%p1474_p9)   ;;  %v1965_v63 = vld [vmem:[#allocation12 + $0x38] sm:$0xff] (!%p1474_p9)  }
 0x209   : > { %1684 = vmatpush3.bf16.msra.mxu0 (!%p1474_p9), %v1958_v50  ;;  %1755 = vmatpush3.bf16.msra.mxu1 (!%p1474_p9), %v1958_v50  ;;  %v972_v50 = vld [vmem:[#allocation2 + $0x30] sm:$0xff] (!%p1474_p9) }
 0x20a   : > { %1685 = vmatprep.subr.bf16.mxu0 (!%p1474_p9), %v1959_v51  ;;  %1748 = vmatprep.subr.bf16.mxu1 (!%p1474_p9), %v1959_v51 }
 0x20d   : > { %1686 = vmatpush3.bf16.msra.mxu0 (!%p1474_p9), %v1959_v51  ;;  %1756 = vmatpush3.bf16.msra.mxu1 (!%p1474_p9), %v1959_v51  ;;  %v980_v51 = vld [vmem:[#allocation2 + $0x70] sm:$0xff] (!%p1474_p9) }
 0x20e   : > { %1687 = vmatprep.subr.bf16.mxu0 (!%p1474_p9), %v1960_v52  ;;  %1749 = vmatprep.subr.bf16.mxu1 (!%p1474_p9), %v1960_v52 }
 0x20f   : > { %1672 = vmatmul.mubr.bf16.gmra.mrb[4].mxu0 %v1956_v0  ;;  %1680 = vmatmul.mubr.bf16.gmra.mrb[4].mxu1 %v1957_v1 }
 0x211   : > { %1688 = vmatpush3.bf16.msra.mxu0 (!%p1474_p9), %v1960_v52  ;;  %1757 = vmatpush3.bf16.msra.mxu1 (!%p1474_p9), %v1960_v52 }
 0x212   : > { %1689 = vmatprep.subr.bf16.mxu0 (!%p1474_p9), %v1961_v53  ;;  %1750 = vmatprep.subr.bf16.mxu1 (!%p1474_p9), %v1961_v53 }
 0x215   : > { %1690 = vmatpush3.bf16.msra.mxu0 (!%p1474_p9), %v1961_v53  ;;  %1758 = vmatpush3.bf16.msra.mxu1 (!%p1474_p9), %v1961_v53 }
 0x216   : > { %1691 = vmatprep.subr.bf16.mxu0 (!%p1474_p9), %v1962_v60  ;;  %1751 = vmatprep.subr.bf16.mxu1 (!%p1474_p9), %v1962_v60 }
 0x219   : > { %1692 = vmatpush3.bf16.msra.mxu0 (!%p1474_p9), %v1962_v60  ;;  %1759 = vmatpush3.bf16.msra.mxu1 (!%p1474_p9), %v1962_v60  ;;  %v973_v60 = vld [vmem:[#allocation2 + $0x38] sm:$0xff] (!%p1474_p9) }
 0x21a   : > { %1693 = vmatprep.subr.bf16.mxu0 (!%p1474_p9), %v1963_v61  ;;  %1752 = vmatprep.subr.bf16.mxu1 (!%p1474_p9), %v1963_v61 }
 0x21d   : > { %1694 = vmatpush3.bf16.msra.mxu0 (!%p1474_p9), %v1963_v61  ;;  %1760 = vmatpush3.bf16.msra.mxu1 (!%p1474_p9), %v1963_v61  ;;  %v981_v61 = vld [vmem:[#allocation2 + $0x78] sm:$0xff] (!%p1474_p9) }
 0x21e   : > { %1695 = vmatprep.subr.bf16.mxu0 (!%p1474_p9), %v1964_v62  ;;  %1753 = vmatprep.subr.bf16.mxu1 (!%p1474_p9), %v1964_v62 }
 0x221   : > { %1696 = vmatpush3.bf16.msra.mxu0 (!%p1474_p9), %v1964_v62  ;;  %1761 = vmatpush3.bf16.msra.mxu1 (!%p1474_p9), %v1964_v62 }
 0x222   : > { %1697 = vmatprep.subr.bf16.mxu0 (!%p1474_p9), %v1965_v63  ;;  %1754 = vmatprep.subr.bf16.mxu1 (!%p1474_p9), %v1965_v63 }
 0x225   : > { %1698 = vmatpush3.bf16.msra.mxu0 (!%p1474_p9), %v1965_v63  ;;  %1762 = vmatpush3.bf16.msra.mxu1 (!%p1474_p9), %v1965_v63 }
 0x2da   : > { %v1669_v6 = vpop.f32.mrb[0].mxu0  ;;  %v1677_v7 = vpop.f32.mrb[0].mxu1 }
 0x2db   : > { %v908_v10 = vadd.f32 %v1669_v6, %v667_v2  ;;  %v916_v11 = vadd.f32 %v1677_v7, %v675_v3  ;;  %v843_v12 = vpop.f32.mrb[1].mxu0  ;;  %v875_v13 = vpop.f32.mrb[1].mxu1 }
 0x2dc   : > { %v906_v16 = vadd.f32 %v843_v12, %v665_v4  ;;  %v914_v17 = vadd.f32 %v875_v13, %v673_v5  ;;  %v1670_v18 = vpop.f32.mrb[2].mxu0  ;;  %v1678_v19 = vpop.f32.mrb[2].mxu1 }
 0x2dd   : > { %924 = vst [vmem:[#allocation3 + $0x10] sm:$0xff] %v908_v10  ;;  %932 = vst [vmem:[#allocation3 + $0x50] sm:$0xff] %v916_v11  ;;  %v909_v20 = vadd.f32 %v1670_v18, %v668_v8  ;;  %v917_v21 = vadd.f32 %v1678_v19, %v676_v9  ;;  %v846_v22 = vpop.f32.mrb[3].mxu0  ;;  %v878_v23 = vpop.f32.mrb[3].mxu1  ;;  %v968_v18 = vld [vmem:[#allocation2 + $0x10] sm:$0xff] (!%p1474_p9) }
 0x2de   : > { %922 = vst [vmem:[#allocation3] sm:$0xff] %v906_v16  ;;  %930 = vst [vmem:[#allocation3 + $0x40] sm:$0xff] %v914_v17  ;;  %v907_v24 = vadd.f32 %v846_v22, %v666_v14  ;;  %v915_v25 = vadd.f32 %v878_v23, %v674_v15  ;;  %v976_v19 = vld [vmem:[#allocation2 + $0x50] sm:$0xff] (!%p1474_p9) }
 0x2df   : > { %925 = vst [vmem:[#allocation3 + $0x18] sm:$0xff] %v909_v20  ;;  %933 = vst [vmem:[#allocation3 + $0x58] sm:$0xff] %v917_v21  ;;  %v966_v20 = vld [vmem:[#allocation2] sm:$0xff] (!%p1474_p9) }
 0x2e0   : > { %923 = vst [vmem:[#allocation3 + $0x8] sm:$0xff] %v907_v24  ;;  %931 = vst [vmem:[#allocation3 + $0x48] sm:$0xff] %v915_v25  ;;  %v974_v21 = vld [vmem:[#allocation2 + $0x40] sm:$0xff] (!%p1474_p9)  ;;  %v969_v24 = vld [vmem:[#allocation2 + $0x18] sm:$0xff] (!%p1474_p9) }
 0x2e1   : > { %v977_v25 = vld [vmem:[#allocation2 + $0x58] sm:$0xff] (!%p1474_p9) }
 0x2e2   : > { %v1673_v30 = vpop.f32.mrb[4].mxu0  ;;  %v1681_v31 = vpop.f32.mrb[4].mxu1  ;;  %941 = sbr.rel (%p1474_p9) target bundleno = 978 (0x3d2), region = 72 }
 0x2e3   : > { %v912_v34 = vadd.f32 %v1673_v30, %v671_v26  ;;  %v920_v35 = vadd.f32 %v1681_v31, %v679_v27  ;;  %v859_v36 = vpop.f32.mrb[5].mxu0  ;;  %v891_v37 = vpop.f32.mrb[5].mxu1  ;;  %v967_v30 = vld [vmem:[#allocation2 + $0x8] sm:$0xff] (!%p1474_p9) }
 0x2e4   : > { %v910_v40 = vadd.f32 %v859_v36, %v669_v28  ;;  %v918_v41 = vadd.f32 %v891_v37, %v677_v29  ;;  %v1674_v42 = vpop.f32.mrb[6].mxu0  ;;  %v1682_v43 = vpop.f32.mrb[6].mxu1  ;;  %v944_v0 = vld [vmem:[#allocation3 + $0x10] sm:$0xff] (!%p1474_p9)  ;;  %v975_v31 = vld [vmem:[#allocation2 + $0x48] sm:$0xff] (!%p1474_p9) }
 0x2e5   : > { %928 = vst [vmem:[#allocation3 + $0x30] sm:$0xff] %v912_v34  ;;  %936 = vst [vmem:[#allocation3 + $0x70] sm:$0xff] %v920_v35  ;;  %v913_v44 = vadd.f32 %v1674_v42, %v672_v32  ;;  %v921_v45 = vadd.f32 %v1682_v43, %v680_v33  ;;  %v862_v46 = vpop.f32.mrb[7].mxu0  ;;  %v894_v47 = vpop.f32.mrb[7].mxu1  ;;  %v942_v54 = vld [vmem:[#allocation3] sm:$0xff] (!%p1474_p9)  ;;  %v952_v2 = vld [vmem:[#allocation3 + $0x50] sm:$0xff] (!%p1474_p9) }
 0x2e6   : > { %926 = vst [vmem:[#allocation3 + $0x20] sm:$0xff] %v910_v40  ;;  %934 = vst [vmem:[#allocation3 + $0x60] sm:$0xff] %v918_v41  ;;  %v911_v48 = vadd.f32 %v862_v46, %v670_v38  ;;  %v919_v49 = vadd.f32 %v894_v47, %v678_v39  ;;  %v950_v56 = vld [vmem:[#allocation3 + $0x40] sm:$0xff] (!%p1474_p9)  ;;  %v945_v1 = vld [vmem:[#allocation3 + $0x18] sm:$0xff] (!%p1474_p9) }
 0x2e7   : > { %929 = vst [vmem:[#allocation3 + $0x38] sm:$0xff] %v913_v44  ;;  %937 = vst [vmem:[#allocation3 + $0x78] sm:$0xff] %v921_v45  ;;  %v943_v55 = vld [vmem:[#allocation3 + $0x8] sm:$0xff] (!%p1474_p9)  ;;  %v953_v3 = vld [vmem:[#allocation3 + $0x58] sm:$0xff] (!%p1474_p9)  ;;  %v959_v8 = vpack.c.bf16 (!%p1474_p9), %v945_v1, %v944_v0 }
 0x2e8   : > { %927 = vst [vmem:[#allocation3 + $0x28] sm:$0xff] %v911_v48  ;;  %935 = vst [vmem:[#allocation3 + $0x68] sm:$0xff] %v919_v49  ;;  %v958_v57 = vpack.c.bf16 (!%p1474_p9), %v943_v55, %v942_v54  ;;  %v951_v58 = vld [vmem:[#allocation3 + $0x48] sm:$0xff] (!%p1474_p9)  ;;  %v963_v9 = vpack.c.bf16 (!%p1474_p9), %v953_v3, %v952_v2  ;;  %v970_v54 = vld [vmem:[#allocation2 + $0x20] sm:$0xff] (!%p1474_p9) }
 0x2e9   : > { %v962_v59 = vpack.c.bf16 %v951_v58, %v950_v56  ;;  %v978_v55 = vld [vmem:[#allocation2 + $0x60] sm:$0xff]  ;;  %v971_v2 = vld [vmem:[#allocation2 + $0x28] sm:$0xff] }
 0x2ea   : > { %1699 = vmatprep.mubr.bf16.mxu0 %v958_v57  ;;  %v979_v3 = vld [vmem:[#allocation2 + $0x68] sm:$0xff] }
 0x2eb   : > { %1707 = vmatprep.mubr.bf16.mxu1 %v962_v59  ;;  %1700 = vmatmul.mubr.bf16.vlgmr.msra.gmra.mrb[0].mxu0 %v959_v8 }
 0x2ec   : > { %1708 = vmatmul.mubr.bf16.vlgmr.msra.gmra.mrb[0].mxu1 %v963_v9  ;;  %v948_v12 = vld [vmem:[#allocation3 + $0x30] sm:$0xff] }
 0x2ed   : > { %v946_v4 = vld [vmem:[#allocation3 + $0x20] sm:$0xff]  ;;  %v956_v14 = vld [vmem:[#allocation3 + $0x70] sm:$0xff] }
 0x2ee   : > { %v954_v6 = vld [vmem:[#allocation3 + $0x60] sm:$0xff]  ;;  %v949_v13 = vld [vmem:[#allocation3 + $0x38] sm:$0xff] }
 0x2ef   : > { %v947_v5 = vld [vmem:[#allocation3 + $0x28] sm:$0xff]  ;;  %v957_v15 = vld [vmem:[#allocation3 + $0x78] sm:$0xff]  ;;  %v961_v16 = vpack.c.bf16 %v949_v13, %v948_v12 }
 0x2f0   : > { %v955_v7 = vld [vmem:[#allocation3 + $0x68] sm:$0xff]  ;;  %v960_v10 = vpack.c.bf16 %v947_v5, %v946_v4  ;;  %v965_v17 = vpack.c.bf16 %v957_v15, %v956_v14 }
 0x2f1   : > { %v964_v11 = vpack.c.bf16 %v955_v7, %v954_v6 }
 0x2f2   : > { %1703 = vmatprep.mubr.bf16.mxu0 %v960_v10 }
 0x2f3   : > { %1711 = vmatprep.mubr.bf16.mxu1 %v964_v11  ;;  %1704 = vmatmul.mubr.bf16.gmra.mrb[4].mxu0 %v961_v16 }
 0x2f4   : > { %1712 = vmatmul.mubr.bf16.gmra.mrb[4].mxu1 %v965_v17 }
 0x3be   : > { %v1701_v22 = vpop.f32.mrb[0].mxu0 }
 0x3bf   : > { %v1709_v23 = vpop.f32.mrb[0].mxu1  ;;  %v1145_v26 = vadd.f32 %v1701_v22, %v968_v18  ;;  %v1080_v28 = vpop.f32.mrb[1].mxu0 }
 0x3c0   : > { %v1153_v27 = vadd.f32 %v1709_v23, %v976_v19  ;;  %v1112_v29 = vpop.f32.mrb[1].mxu1  ;;  %v1143_v32 = vadd.f32 %v1080_v28, %v966_v20  ;;  %v1702_v34 = vpop.f32.mrb[2].mxu0 }
 0x3c1   : > { %v1151_v33 = vadd.f32 %v1112_v29, %v974_v21  ;;  %v1710_v35 = vpop.f32.mrb[2].mxu1  ;;  %v1146_v36 = vadd.f32 %v1702_v34, %v969_v24  ;;  %v1083_v38 = vpop.f32.mrb[3].mxu0  ;;  %v1161_v42 = vmax.f32 %v1145_v26, 0.0 }
 0x3c2   : > { %v1154_v37 = vadd.f32 %v1710_v35, %v977_v25  ;;  %v1115_v39 = vpop.f32.mrb[3].mxu1  ;;  %v1144_v40 = vadd.f32 %v1083_v38, %v967_v30  ;;  %v1169_v43 = vmax.f32 %v1153_v27, 0.0  ;;  %v1159_v46 = vmax.f32 %v1143_v32, 0.0 }
 0x3c3   : > { %v1152_v41 = vadd.f32 %v1115_v39, %v975_v31  ;;  %v1162_v44 = vmax.f32 %v1146_v36, 0.0  ;;  %v1167_v47 = vmax.f32 %v1151_v33, 0.0 }
 0x3c4   : > { %v1170_v45 = vmax.f32 %v1154_v37, 0.0  ;;  %v1160_v48 = vmax.f32 %v1144_v40, 0.0 }
 0x3c5   : > { %v1168_v49 = vmax.f32 %v1152_v41, 0.0  ;;  %v1532_v52 = vpack.c.bf16 %v1162_v44, %v1161_v42 }
 0x3c6   : > { %v1552_v53 = vpack.c.bf16 %v1170_v45, %v1169_v43  ;;  %v1527_v56 = vpack.c.bf16 %v1160_v48, %v1159_v46  ;;  %v1705_v58 = vpop.f32.mrb[4].mxu0 }
 0x3c7   : > { %v1547_v57 = vpack.c.bf16 %v1168_v49, %v1167_v47  ;;  %v1713_v59 = vpop.f32.mrb[4].mxu1  ;;  %1564 = vst [vmem:[%s2722_s20 + $0x8] sm:$0xff] %v1532_v52   ;;  %v1149_v62 = vadd.f32 %v1705_v58, %v972_v50  ;;  %v1096_v0 = vpop.f32.mrb[5].mxu0 }
 0x3c8   : > { %1568 = vst [vmem:[%s2722_s20 + $0x28] sm:$0xff] %v1552_v53   ;;  %v1157_v63 = vadd.f32 %v1713_v59, %v980_v51  ;;  %v1128_v1 = vpop.f32.mrb[5].mxu1  ;;  %1528 = vst [vmem:[%s2722_s20] sm:$0xff] %v1527_v56   ;;  %v1147_v4 = vadd.f32 %v1096_v0, %v970_v54  ;;  %v1706_v6 = vpop.f32.mrb[6].mxu0 }
 0x3c9   : > { %1567 = vst [vmem:[%s2722_s20 + $0x20] sm:$0xff] %v1547_v57   ;;  %v1155_v5 = vadd.f32 %v1128_v1, %v978_v55  ;;  %v1714_v7 = vpop.f32.mrb[6].mxu1  ;;  %v1150_v8 = vadd.f32 %v1706_v6, %v973_v60  ;;  %v1099_v10 = vpop.f32.mrb[7].mxu0  ;;  %v1165_v14 = vmax.f32 %v1149_v62, 0.0 }
 0x3ca   : > { %v1158_v9 = vadd.f32 %v1714_v7, %v981_v61  ;;  %v1131_v11 = vpop.f32.mrb[7].mxu1  ;;  %v1148_v12 = vadd.f32 %v1099_v10, %v971_v2  ;;  %v1173_v15 = vmax.f32 %v1157_v63, 0.0  ;;  %v1163_v18 = vmax.f32 %v1147_v4, 0.0 }
 0x3cb   : > { %v1156_v13 = vadd.f32 %v1131_v11, %v979_v3  ;;  %v1166_v16 = vmax.f32 %v1150_v8, 0.0  ;;  %v1171_v19 = vmax.f32 %v1155_v5, 0.0 }
 0x3cc   : > { %v1174_v17 = vmax.f32 %v1158_v9, 0.0  ;;  %v1164_v20 = vmax.f32 %v1148_v12, 0.0 }
 0x3cd   : > { %v1172_v21 = vmax.f32 %v1156_v13, 0.0  ;;  %v1542_v22 = vpack.c.bf16 %v1166_v16, %v1165_v14 }
 0x3ce   : > { %v1562_v23 = vpack.c.bf16 %v1174_v17, %v1173_v15  ;;  %v1537_v24 = vpack.c.bf16 %v1164_v20, %v1163_v18 }
 0x3cf   : > { %v1557_v25 = vpack.c.bf16 %v1172_v21, %v1171_v19  ;;  %1566 = vst [vmem:[%s2722_s20 + $0x18] sm:$0xff] %v1542_v22  }
 0x3d0   : > { %1570 = vst [vmem:[%s2722_s20 + $0x38] sm:$0xff] %v1562_v23   ;;  %1565 = vst [vmem:[%s2722_s20 + $0x10] sm:$0xff] %v1537_v24  }
 0x3d1   : > { %1569 = vst [vmem:[%s2722_s20 + $0x30] sm:$0xff] %v1557_v25  }
 0x3d2 PF: > { %s2927_s27 = sld [smem:[#allocation22_spill]]  ;;  %s2928_s0 = sld [smem:[#allocation31_spill]] }
 0x3d3   : > { %s1269_s12 = sshll.u32 %s2722_s20, 4  ;;  %s2772_s17 = scalar_lea.sflag [#allocation6], %s343_s16  ;;  %s2768_s12 = int_to_ptr.vmem [resolvable:$true] %s1269_s12 }
 0x3d4   : > { %s2112_s5 = scalar_lea.vmem %s2768_s12, 1024  ;;  %p2929_p8 = scmp.ne.s32.totalorder %s2911_s26, 0 }
 0x3d5   : > { %p2113_p10 = scmp.ne.s32.totalorder %s2768_s12, %s2112_s5  ;;  %s2281_s13 = smov [#allocation13]  }
 0x3d6   : > { %s2116_s19 = sshll.u32 %s2281_s13, 4  ;;  %s2117_s19 = int_to_ptr.vmem [resolvable:$false] %s2116_s19 }
 0x3d7   : > { %p2114_p11 = pnand %p2113_p10, %p2929_p8  ;;  %s2118_s11 = scalar_lea.vmem %s2117_s19, 2048 }
 0x3d8   : > { %s1523_s1 = sshll.u32 %s2927_s27, 10  ;;  %p2119_p5 = scmp.lt.s32.totalorder %s2768_s12, %s2117_s19 }
 0x3d9   : > { %s2765_s18 = scalar_lea.hbm %s2928_s0, %s1523_s1  ;;  %p2115_p3 = pneg %p2114_p11 }
 0x3da   : > { %p2120_p1 = scmp.lt.s32.totalorder %s2118_s11, %s2112_s5 }
 0x3dc   : > { %p2121_p4 = por %p2120_p1, %p2119_p5 }
 0x3de   : > { %p2122_p2 = pnand %p2121_p4, %p2115_p3 }
 0x3e0   : > { %2125 = shalt.err (!%p2122_p2)
}
 0x3e1   : > { %s2126_s16 = scalar_lea.hbm %s2765_s18, 1024  ;;  %s2130_s25 = scalar_lea.hbm %s2928_s0, 2048 }
 0x3e2   : > { %p2127_p6 = scmp.ne.s32.totalorder %s2765_s18, %s2126_s16  ;;  %p2131_p0 = scmp.lt.u32.totalorder %s2765_s18, %s2928_s0 }
 0x3e3   : > { %p2132_p12 = scmp.lt.u32.totalorder %s2130_s25, %s2126_s16  ;;  %p2134_p10 = scmp.lt.u32.totalorder %s2126_s16, %s2765_s18 }
 0x3e4   : > { %p2128_p7 = pnand %p2127_p6, %p2929_p8 }
 0x3e5   : > { %p2133_p9 = por %p2132_p12, %p2131_p0 }
 0x3e6   : > { %p2129_p13 = pneg %p2128_p7 }
 0x3e7   : > { %p2135_p11 = por %p2134_p10, %p2133_p9 }
 0x3e9   : > { %p2136_p3 = pnand %p2135_p11, %p2129_p13 }
 0x3eb   : > { %2139 = shalt.err (!%p2136_p3)
}
 0x3ec   : > { %s2282_s1 = smov 64   ;;  %s2283_s3 = smov 4  }
 0x3ed   : > { %1777 = dma.vmem_to_hbm [thread:$0]  (%p2929_p8), %s2768_s12, 1024, %s2765_s18, %s2772_s17, %s2282_s1, %s2282_s1, %s2283_s3  }
 0x3ee PF: > { %p1805_p5 = scmp.ge.s32.totalorder %s2270_s10, 2  ;;  %s1284_s30 = sand.u32 1, %s2218_s21  }
 0x3ef   : > { %p2930_p1 = scmp.ne.s32.totalorder %s2914_s15, 0  ;;  %s1285_s5 = scalar_lea.sflag [#allocation6], %s1284_s30 }
 0x3f1   : > { %p1797_p4 = pnand %p1805_p5, %p2930_p1 }
 0x3f3   : > { %2213 = dma.done.wait (!%p1797_p4), %s1285_s5, 1024  }
 0x3f4   : > { %2215 = vsyncadd (!%p1797_p4), %s1285_s5, 4294966272  ;;  %s26_s10 = sadd.s32 1, %s2270_s10   ;;  %s2932_s26 = sld [smem:[#allocation19_spill]] }
 0x3f5   : > { %p2801_p2 = scmp.ge.s32.totalorder %s26_s10, 6   ;;  %s2933_s25 = sld [smem:[#allocation20_spill]] }
 0x3f6   : > { %s2934_s18 = sld [smem:[#allocation25_spill]]  ;;  %s2935_s15 = sld [smem:[#allocation23_spill]] }
 0x3f7   : > { %s2936_s12 = sld [smem:[#allocation24_spill]]  ;;  %s2937_s21 = smov %s2222_s22 }
 0x3f8   : > { %s2938_s22 = smov %s2226_s23  ;;  %s2939_s23 = smov %s2620_s24 }
 0x3f9   : > { %s2942_s27 = smov %s2246_s28  ;;  %s2943_s28 = smov %s2250_s29 }
 0x3fa   : > { %s2940_s24 = smov %s2932_s26  ;;  %s2944_s29 = smov %s2553_s14 }
 0x3fb   : > { %s2945_s30 = smov %s2262_s8  ;;  %s2946_s7 = smov %s2266_s9 }
 0x3fc   : > { %s2941_s26 = smov %s2934_s18  ;;  %s2947_s8 = smov %s2935_s15 }
 0x3fd   : > { %s2948_s9 = smov %s2936_s12  ;;  %25 = sbr.rel (!%p2801_p2) target bundleno = 19 (0x13), region = 129 }
 0x404   :  { %1290 = vsyncpa [#allocation5], 1 }
 0x405   :  { %1292 = vsyncpa [#allocation5 + $0x1], 1 }
 0x406   :  { %1293 = vsyncpa [#allocation8], 1 }
 0x407   :  { %1295 = vsyncpa [#allocation8 + $0x1], 1 }
 0x408   :  { %1296 = vsyncpa [#allocation11], 1 }
 0x409   :  { %1297 = vsyncpa [#allocation6], 1 }
 0x40a   :  { %1299 = vsyncpa [#allocation6 + $0x1], 1 }

</bundles_post_ra>
